<compile_context>
chip_gen: v7x
topology: tpu7x:2x2x1
jax: 0.10.0
libtpu: 0.0.40
codegen_flags: <defaults>
</compile_context>

<pallas_src>
import numpy as np

import jax
import jax.numpy as jnp
from jax.experimental import pallas as pl
from jax.experimental.pallas import tpu as pltpu


def _identity_dma_kernel(x_hbm_ref, o_hbm_ref, sem):
    # One whole-array HBM->HBM DMA: no VMEM staging, no TensorCore vld/vst.
    cp = pltpu.make_async_copy(x_hbm_ref, o_hbm_ref, sem)
    cp.start()
    cp.wait()


def _identity_dma(x: jax.Array) -> jax.Array:
    """Single HBM->HBM DMA copy of `x` through a real pallas_call."""
    nbytes = x.size * jnp.dtype(x.dtype).itemsize
    return pl.pallas_call(
        _identity_dma_kernel,
        out_shape=jax.ShapeDtypeStruct(x.shape, x.dtype),
        in_specs=[pl.BlockSpec(memory_space=pl.ANY)],
        out_specs=pl.BlockSpec(memory_space=pl.ANY),
        scratch_shapes=[pltpu.SemaphoreType.DMA(())],
        compiler_params=pltpu.CompilerParams(
            vmem_limit_bytes=32 * 1024 * 1024,
        ),
        cost_estimate=pl.CostEstimate(
            flops=0,
            transcendentals=0,
            bytes_accessed=2 * nbytes,
        ),
    )(x)


def dl_baseline_forward(x: jax.Array, *, force_kernel: bool = False) -> jax.Array:
    """Pallas equivalent of DLBaseline.forward (identity stand-in).

    The PyTorch module performs no computation, so the default path returns
    `x` untouched (zero HBM traffic).  Set force_kernel=True to route through
    an actual pallas_call (single HBM->HBM DMA copy) for debug / validation.
    """
    if not force_kernel:
        return x
    return _identity_dma(x)


if __name__ == "__main__":
    key = jax.random.PRNGKey(0)
    # Small NCHW input consistent with a conv-style baseline module.
    x = jax.random.normal(key, (2, 4, 16, 16), dtype=jnp.float32)
    x_host = jax.device_get(x)

    # Fast path (what library callers get): pure pass-through, zero work.
    y_fast = dl_baseline_forward(x)
    assert y_fast.shape == x.shape and y_fast.dtype == x.dtype
    assert np.array_equal(jax.device_get(y_fast), x_host)

    # Kernel path: exercise the Pallas HBM->HBM DMA copy once on TPU.
    y = dl_baseline_forward(x, force_kernel=True)
    jax.block_until_ready(y)

    # Sanity: identity pass-through must preserve the input exactly.
    assert y.shape == x.shape and y.dtype == x.dtype
    assert np.array_equal(jax.device_get(y), x_host)

    print("KERNEL_OK")
</pallas_src>

<mosaic_0001>
module attributes {stable_mosaic.version = 11 : i64} {
  func.func @_identity_dma_kernel(%arg0: memref<2x4x16x16xf32, #tpu.memory_space<any>>, %arg1: memref<2x4x16x16xf32, #tpu.memory_space<any>>, %arg2: memref<!tpu.dma_semaphore, #tpu.memory_space<semaphore_mem>>) attributes {dimension_semantics = [], scalar_prefetch = 0 : i64, scratch_operands = 1 : i64, tpu.core_type = #tpu.core_type<tc>} {
    tpu.enqueue_dma source(%arg0 : memref<2x4x16x16xf32, #tpu.memory_space<any>>) target(%arg1 : memref<2x4x16x16xf32, #tpu.memory_space<any>>) target_semaphore(%arg2 : memref<!tpu.dma_semaphore, #tpu.memory_space<semaphore_mem>>)
    tpu.wait_dma2 semaphore(%arg2 : memref<!tpu.dma_semaphore, #tpu.memory_space<semaphore_mem>>) src(%arg0 : memref<2x4x16x16xf32, #tpu.memory_space<any>>) dst(%arg1 : memref<2x4x16x16xf32, #tpu.memory_space<any>>)
    return
  }
}

</mosaic_0001>

<bundles_post_ra>
// kernel: tpu_custom_call.1
= control target key start
LH: loop header
LB: loop body
LE: loop exit
PB: predicated region body
PF: predicated region fallthrough
CT: control target
= control target key end

     0   :  { %s36_s6 = smov [#allocation2]   ;;  %s37_s7 = smov [#allocation3]   ;;  %s55_s0 = inlined_call_operand.hbm [shape: f32[2,4,16,16], index: 0, kind: input, shape index: {}]   ;;  %s56_s1 = inlined_call_operand.hbm [shape: f32[2,4,16,16], index: 1, kind: output, shape index: {}]  }
   0x1   :  { %s38_s8 = smov 0  }
   0x2   :  { %18 = dma.general %s55_s0, 2048, %s56_s1, %s36_s6, %s37_s7, [#allocation4], %s38_s8, 0  }
   0x3   :  { %34 = dma.done.wait [#allocation2], 2048 }
   0x4   :  { %35 = vsyncadd [#allocation2], 4294965248 }
   0x5   :  { %24 = vsyncmov [#allocation2] }
   0x8   :  { %s25_s13 = vpop.sfrf %24 }
   0x9   :  { %p30_p0 = scmp.ne.s32.totalorder %s25_s13, 0 }
   0xb   :  { %29 = shalt.err (%p30_p0)  }

</bundles_post_ra>
